<compile_context>
chip_gen: v6e
topology: v6e:2x2x1
jax: 0.10.0
libtpu: 0.0.40
codegen_flags: <defaults>
</compile_context>

<pallas_src>
import jax
import jax.numpy as jnp
from jax.experimental import pallas as pl
from jax.experimental.pallas import tpu as pltpu


def _round_up(x, m):
    return ((x + m - 1) // m) * m


def critic_kernel(xt_ref, w1_ref, b1_ref, w2_ref, b2_ref, w3_ref, b3_ref,
                  o_ref):
    """One batch tile of the fused 3-layer MLP, computed transposed.

    xt_ref : (in_pad, tile_b)  bf16   -- cat([state, action])^T tile (streamed)
    w1_ref : (H1_pad, in_pad)  bf16   -- torch-layout (out, in), resident
    w2_ref : (H2_pad, H1_pad)  bf16   -- torch-layout (out, in), resident
    b*_ref : (H*_pad, 1)       f32    -- bias columns, resident
    w3_ref : (H2_pad, 1)       f32    -- final weight column, resident
    o_ref  : (1, tile_b)       f32    -- lane-dense q row
    """
    # Layer 1: h1^T = relu(W1 @ x^T + b1)   -> (H1_pad, tile_b), f32 accumulate
    h1 = jnp.dot(w1_ref[...], xt_ref[...], preferred_element_type=jnp.float32)
    h1 = jnp.maximum(h1 + b1_ref[...], 0.0)

    # Layer 2: h2^T = relu(W2 @ h1^T + b2)  -> (H2_pad, tile_b)
    h2 = jnp.dot(w2_ref[...], h1.astype(w2_ref.dtype),
                 preferred_element_type=jnp.float32)
    h2 = jnp.maximum(h2 + b2_ref[...], 0.0)

    # Layer 3: out_features == 1 -> VPU multiply + cross-sublane (XLU) reduce.
    # Result is (1, tile_b): already lane-dense, so no masked stores and no
    # relayout; keeps the MXU free of a single-column matmul.
    q = jnp.sum(h2 * w3_ref[...], axis=0, keepdims=True) + b3_ref[...]
    o_ref[...] = q.astype(o_ref.dtype)


def critic_forward(state, action, params, *, tile_b=1024,
                   compute_dtype=jnp.bfloat16):
    """Runs the fused critic MLP with a batch-tiled, pipelined Pallas kernel.

    `params` is the torch-layout tuple ((W1,b1),(W2,b2),(W3,b3)) with weights
    stored as (out_features, in_features), biases as (out_features,).
    """
    (l1_w, l1_b), (l2_w, l2_b), (l3_w, l3_b) = params
    state_dim = state.shape[1]
    act_dim = action.shape[1]
    in_dim = state_dim + act_dim
    h1_dim = l1_w.shape[0]
    h2_dim = l2_w.shape[0]
    B = state.shape[0]

    # Alignment padding: input dim -> 16 (bf16 sublane packing), hidden dims
    # -> 128 (clean MXU / lane tiling).  All padding is zeros, which is exact.
    in_pad = _round_up(in_dim, 16)
    h1_pad = _round_up(h1_dim, 128)
    h2_pad = _round_up(h2_dim, 128)

    # Batch tile: multiple of 128 lanes (batch sits on the lane axis), capped
    # so the grid has >= 2 steps whenever the batch allows (v7x: lets the
    # "parallel" batch axis shard across both TensorCores).
    b_min = _round_up(B, 128)
    tile_b = max(128, min(_round_up(tile_b, 128), b_min))
    if b_min >= 256 and tile_b > b_min // 2:
        tile_b = _round_up(b_min // 2, 128)
    b_pad = _round_up(B, tile_b)
    grid = (b_pad // tile_b,)

    # Input prep: fused concat (kills the split layer-1 matmuls), pad, and
    # transpose so the batch is the lane (last) axis.
    x = jnp.concatenate([state, action], axis=1).astype(compute_dtype)
    x = jnp.pad(x, ((0, b_pad - B), (0, in_pad - in_dim)))
    xt = x.T                                              # (in_pad, b_pad)

    # Weight prep: torch (out, in) layout is what the transposed form needs,
    # so only zero-padding + dtype casts here.
    w1 = jnp.pad(l1_w, ((0, h1_pad - h1_dim),
                        (0, in_pad - in_dim))).astype(compute_dtype)
    b1 = jnp.pad(l1_b, (0, h1_pad - h1_dim)
                 ).reshape(h1_pad, 1).astype(jnp.float32)
    w2 = jnp.pad(l2_w, ((0, h2_pad - h2_dim),
                        (0, h1_pad - h1_dim))).astype(compute_dtype)
    b2 = jnp.pad(l2_b, (0, h2_pad - h2_dim)
                 ).reshape(h2_pad, 1).astype(jnp.float32)
    w3 = jnp.pad(l3_w.reshape(h2_dim), (0, h2_pad - h2_dim)
                 ).reshape(h2_pad, 1).astype(jnp.float32)
    b3 = l3_b.reshape(1, 1).astype(jnp.float32)

    resident = lambda i: (0, 0)   # weights / biases: same block every step

    out = pl.pallas_call(
        critic_kernel,
        out_shape=jax.ShapeDtypeStruct((1, b_pad), jnp.float32),
        grid=grid,
        in_specs=[
            pl.BlockSpec((in_pad, tile_b), lambda i: (0, i)),   # x^T tile
            pl.BlockSpec((h1_pad, in_pad), resident),           # W1
            pl.BlockSpec((h1_pad, 1), resident),                # b1
            pl.BlockSpec((h2_pad, h1_pad), resident),           # W2
            pl.BlockSpec((h2_pad, 1), resident),                # b2
            pl.BlockSpec((h2_pad, 1), resident),                # W3 column
            pl.BlockSpec((1, 1), resident),                     # b3
        ],
        out_specs=pl.BlockSpec((1, tile_b), lambda i: (0, i)),  # lane-dense q
        compiler_params=pltpu.CompilerParams(
            dimension_semantics=("parallel",),      # v7x: shard over 2 TCs
            vmem_limit_bytes=32 * 1024 * 1024,      # headroom for v7x's 64 MiB
        ),
    )(xt, w1, b1, w2, b2, w3, b3)

    return out[0, :B].reshape(B, 1)


def make_critic_params(key, state_dim=12, act_dim=2, hidden_size=(500, 500)):
    """Torch-layout params: xavier_uniform weights, default torch bias init."""
    in_dim = state_dim + act_dim
    h1, h2 = hidden_size
    ks = jax.random.split(key, 6)

    def xavier(k, fan_out, fan_in):
        bound = (6.0 / (fan_in + fan_out)) ** 0.5
        return jax.random.uniform(k, (fan_out, fan_in), jnp.float32,
                                  -bound, bound)

    def bias(k, fan_in, fan_out):
        bound = 1.0 / (fan_in ** 0.5)
        return jax.random.uniform(k, (fan_out,), jnp.float32, -bound, bound)

    return (
        (xavier(ks[0], h1, in_dim), bias(ks[1], in_dim, h1)),
        (xavier(ks[2], h2, h1), bias(ks[3], h1, h2)),
        (xavier(ks[4], 1, h2), bias(ks[5], h2, 1)),
    )


def critic_reference(state, action, params):
    """Pure-JAX f32 reference matching the PyTorch forward."""
    (l1_w, l1_b), (l2_w, l2_b), (l3_w, l3_b) = params
    x = jnp.concatenate([state, action], axis=1)
    x = jnp.maximum(x @ l1_w.T + l1_b, 0.0)
    x = jnp.maximum(x @ l2_w.T + l2_b, 0.0)
    return x @ l3_w.T + l3_b


if __name__ == "__main__":
    state_dim, act_dim = 12, 2
    hidden_size = (32, 32)   # small shapes for the synthetic test
    batch = 256              # tile_b auto-caps to 128 -> 2 pipelined grid steps

    key = jax.random.PRNGKey(0)
    k_params, k_state, k_action = jax.random.split(key, 3)

    params = make_critic_params(k_params, state_dim, act_dim, hidden_size)
    state = jax.random.normal(k_state, (batch, state_dim), jnp.float32)
    action = jax.random.normal(k_action, (batch, act_dim), jnp.float32)

    q = critic_forward(state, action, params)
    q = jax.block_until_ready(q)

    ref = critic_reference(state, action, params)
    assert q.shape == (batch, 1), q.shape
    # bf16 streaming operands / weights -> loosened tolerance vs f32 reference.
    max_err = float(jnp.max(jnp.abs(q - ref)))
    assert jnp.allclose(q, ref, atol=1e-1, rtol=1e-1), max_err

    print("KERNEL_OK")
</pallas_src>

<mosaic_0001>
module attributes {stable_mosaic.version = 11 : i64} {
  func.func @critic_kernel(%arg0: i32, %arg1: memref<16x128xbf16, #tpu.memory_space<vmem>>, %arg2: memref<128x16xbf16, #tpu.memory_space<vmem>>, %arg3: memref<128x1xf32, #tpu.memory_space<vmem>>, %arg4: memref<128x128xbf16, #tpu.memory_space<vmem>>, %arg5: memref<128x1xf32, #tpu.memory_space<vmem>>, %arg6: memref<128x1xf32, #tpu.memory_space<vmem>>, %arg7: memref<1x1xf32, #tpu.memory_space<vmem>>, %arg8: memref<1x128xf32, #tpu.memory_space<vmem>>) attributes {dimension_semantics = [#tpu.dimension_semantics<parallel>], iteration_bounds = array<i64: 2>, scalar_prefetch = 0 : i64, scratch_operands = 0 : i64, tpu.core_type = #tpu.core_type<tc>, window_params = [{transform_indices = @transform_0, window_bounds = array<i64: 16, 128>}, {pipeline_mode = #tpu.pipeline_mode<synchronous>, transform_indices = @transform_1, window_bounds = array<i64: 128, 16>}, {pipeline_mode = #tpu.pipeline_mode<synchronous>, transform_indices = @transform_2, window_bounds = array<i64: 128, 1>}, {pipeline_mode = #tpu.pipeline_mode<synchronous>, transform_indices = @transform_3, window_bounds = array<i64: 128, 128>}, {pipeline_mode = #tpu.pipeline_mode<synchronous>, transform_indices = @transform_4, window_bounds = array<i64: 128, 1>}, {pipeline_mode = #tpu.pipeline_mode<synchronous>, transform_indices = @transform_5, window_bounds = array<i64: 128, 1>}, {pipeline_mode = #tpu.pipeline_mode<synchronous>, transform_indices = @transform_6, window_bounds = array<i64: 1, 1>}, {transform_indices = @transform_7, window_bounds = array<i64: 1, 128>}]} {
    %c0 = arith.constant 0 : index
    %c0_0 = arith.constant 0 : index
    %0 = vector.load %arg2[%c0, %c0_0] : memref<128x16xbf16, #tpu.memory_space<vmem>>, vector<128x16xbf16>
    %c0_1 = arith.constant 0 : index
    %c0_2 = arith.constant 0 : index
    %1 = vector.load %arg1[%c0_1, %c0_2] : memref<16x128xbf16, #tpu.memory_space<vmem>>, vector<16x128xbf16>
    %cst = arith.constant dense<0.000000e+00> : vector<128x128xf32>
    %2 = tpu.matmul %0, %1, %cst {dimension_numbers = #tpu.dot_dimension_numbers<[1], [0], [0], [1], [0, 0, 1, 1], [], []>} : vector<128x16xbf16>, vector<16x128xbf16>, vector<128x128xf32> -> vector<128x128xf32>
    %c0_3 = arith.constant 0 : index
    %c0_4 = arith.constant 0 : index
    %3 = vector.load %arg3[%c0_3, %c0_4] : memref<128x1xf32, #tpu.memory_space<vmem>>, vector<128x1xf32>
    %4 = vector.broadcast %3 : vector<128x1xf32> to vector<128x128xf32>
    %5 = arith.addf %2, %4 : vector<128x128xf32>
    %cst_5 = arith.constant 0.000000e+00 : f32
    %6 = vector.broadcast %cst_5 : f32 to vector<128x128xf32>
    %7 = arith.maximumf %5, %6 : vector<128x128xf32>
    %c0_6 = arith.constant 0 : index
    %c0_7 = arith.constant 0 : index
    %8 = vector.load %arg4[%c0_6, %c0_7] : memref<128x128xbf16, #tpu.memory_space<vmem>>, vector<128x128xbf16>
    %9 = arith.truncf %7 : vector<128x128xf32> to vector<128x128xbf16>
    %cst_8 = arith.constant dense<0.000000e+00> : vector<128x128xf32>
    %10 = tpu.matmul %8, %9, %cst_8 {dimension_numbers = #tpu.dot_dimension_numbers<[1], [0], [0], [1], [0, 0, 1, 1], [], []>} : vector<128x128xbf16>, vector<128x128xbf16>, vector<128x128xf32> -> vector<128x128xf32>
    %c0_9 = arith.constant 0 : index
    %c0_10 = arith.constant 0 : index
    %11 = vector.load %arg5[%c0_9, %c0_10] : memref<128x1xf32, #tpu.memory_space<vmem>>, vector<128x1xf32>
    %12 = vector.broadcast %11 : vector<128x1xf32> to vector<128x128xf32>
    %13 = arith.addf %10, %12 : vector<128x128xf32>
    %cst_11 = arith.constant 0.000000e+00 : f32
    %14 = vector.broadcast %cst_11 : f32 to vector<128x128xf32>
    %15 = arith.maximumf %13, %14 : vector<128x128xf32>
    %c0_12 = arith.constant 0 : index
    %c0_13 = arith.constant 0 : index
    %16 = vector.load %arg6[%c0_12, %c0_13] : memref<128x1xf32, #tpu.memory_space<vmem>>, vector<128x1xf32>
    %17 = vector.broadcast %16 : vector<128x1xf32> to vector<128x128xf32>
    %18 = arith.mulf %15, %17 : vector<128x128xf32>
    %cst_14 = arith.constant dense<0.000000e+00> : vector<128xf32>
    %19 = vector.multi_reduction <add>, %18, %cst_14 [0] : vector<128x128xf32> to vector<128xf32>
    %20 = vector.shape_cast %19 : vector<128xf32> to vector<1x128xf32>
    %c0_15 = arith.constant 0 : index
    %c0_16 = arith.constant 0 : index
    %21 = vector.load %arg7[%c0_15, %c0_16] : memref<1x1xf32, #tpu.memory_space<vmem>>, vector<1x1xf32>
    %22 = vector.broadcast %21 : vector<1x1xf32> to vector<1x128xf32>
    %23 = arith.addf %20, %22 : vector<1x128xf32>
    %c0_17 = arith.constant 0 : index
    %c0_18 = arith.constant 0 : index
    %24 = vector.load %arg8[%c0_17, %c0_18] : memref<1x128xf32, #tpu.memory_space<vmem>>, vector<1x128xf32>
    tpu.vector_store %arg8[%c0_17, %c0_18], %23 {strides = array<i32>} : memref<1x128xf32, #tpu.memory_space<vmem>>, vector<1x128xf32>,
    return
  }
  func.func @transform_0(%arg0: i32) -> (i32, i32) {
    %c0_i32 = arith.constant 0 : i32
    %c0_i32_0 = arith.constant 0 : i32
    return %c0_i32, %arg0 : i32, i32
  }
  func.func @transform_1(%arg0: i32) -> (i32, i32) {
    %c0_i32 = arith.constant 0 : i32
    %c0_i32_0 = arith.constant 0 : i32
    %c0_i32_1 = arith.constant 0 : i32
    return %c0_i32, %c0_i32_0 : i32, i32
  }
  func.func @transform_2(%arg0: i32) -> (i32, i32) {
    %c0_i32 = arith.constant 0 : i32
    %c0_i32_0 = arith.constant 0 : i32
    %c0_i32_1 = arith.constant 0 : i32
    return %c0_i32, %c0_i32_0 : i32, i32
  }
  func.func @transform_3(%arg0: i32) -> (i32, i32) {
    %c0_i32 = arith.constant 0 : i32
    %c0_i32_0 = arith.constant 0 : i32
    %c0_i32_1 = arith.constant 0 : i32
    return %c0_i32, %c0_i32_0 : i32, i32
  }
  func.func @transform_4(%arg0: i32) -> (i32, i32) {
    %c0_i32 = arith.constant 0 : i32
    %c0_i32_0 = arith.constant 0 : i32
    %c0_i32_1 = arith.constant 0 : i32
    return %c0_i32, %c0_i32_0 : i32, i32
  }
  func.func @transform_5(%arg0: i32) -> (i32, i32) {
    %c0_i32 = arith.constant 0 : i32
    %c0_i32_0 = arith.constant 0 : i32
    %c0_i32_1 = arith.constant 0 : i32
    return %c0_i32, %c0_i32_0 : i32, i32
  }
  func.func @transform_6(%arg0: i32) -> (i32, i32) {
    %c0_i32 = arith.constant 0 : i32
    %c0_i32_0 = arith.constant 0 : i32
    %c0_i32_1 = arith.constant 0 : i32
    return %c0_i32, %c0_i32_0 : i32, i32
  }
  func.func @transform_7(%arg0: i32) -> (i32, i32) {
    %c0_i32 = arith.constant 0 : i32
    %c0_i32_0 = arith.constant 0 : i32
    return %c0_i32, %arg0 : i32, i32
  }
}

</mosaic_0001>

<bundles_post_ra>
// kernel: tpu_custom_call.1
= control target key start
LH: loop header
LB: loop body
LE: loop exit
PB: predicated region body
PF: predicated region fallthrough
CT: control target
= control target key end

     0   :  { %s1725_s0 = inlined_call_operand.vmem [shape: bf16[16,256], index: 0, kind: input, shape index: {}]   ;;  %s1726_s1 = inlined_call_operand.vmem [shape: bf16[128,16], index: 1, kind: input, shape index: {}]   ;;  %s1727_s2 = inlined_call_operand.vmem [shape: f32[128,1], index: 2, kind: input, shape index: {}]   ;;  %s1728_s3 = inlined_call_operand.vmem [shape: bf16[128,128], index: 3, kind: input, shape index: {}]   ;;  %s1729_s4 = inlined_call_operand.vmem [shape: f32[128,1], index: 4, kind: input, shape index: {}]   ;;  %s1730_s5 = inlined_call_operand.vmem [shape: f32[128,1], index: 5, kind: input, shape index: {}]   ;;  %s1731_s6 = inlined_call_operand.<no memory space> [shape: f32[1,1], index: 6, kind: input, shape index: {}]   ;;  %s1732_s7 = inlined_call_operand.hbm [shape: f32[1,256], index: 7, kind: output, shape index: {}]  }
   0x1   :  { %v12_v0 = vstv %s1731_s6 }
   0x2   :  { %13 = vst [vmem:[#allocation2] sm:$0x1] %v12_v0 }
   0x3   :  { %14 = vsyncpa [#allocation5], 0 }
   0x4   :  { %16 = vsyncpa [#allocation5 + $0x1], 0  ;;  %s1416_s26 = smov 0   ;;  %s1418_s27 = smov 0  }
   0x5   :  { %s1420_s28 = smov 0   ;;  %s1422_s29 = smov 0  }
   0x6 LB: > { %s1123_s6 = sadd.s32 4294967295, %s1369_s29   ;;  %s1124_s30 = sadd.s32 4294967294, %s1369_s29   ;;  %s1369_s29 = sphi %s1422_s29, %s1740_s29   ;;  %s1365_s28 = sphi %s1420_s28, %s1739_s28   ;;  %s1361_s27 = sphi %s1418_s27, %s1738_s27   ;;  %s1357_s26 = sphi %s1416_s26, %s1737_s26  }
   0x7   : > { %s1439_s8 = sadd.s32 1, %s1369_s29   ;;  %s29_s9 = sadd.s32 1, %s1365_s28 }
   0x8   : > { %s26_s10 = ssub.s32 %s1369_s29, %s1439_s8  ;;  %p36_p0 = scmp.ne.s32.totalorder %s1365_s28, %s1361_s27 }
   0x9   : > { %p27_p1 = scmp.eq.s32.totalorder %s26_s10, 0  ;;  %p37_p2 = scmp.eq.s32.totalorder %s1369_s29, 0 }
   0xa   : > { %p192_p3 = scmp.eq.s32.totalorder %s1123_s6, 1  ;;  %p197_p4 = scmp.ne.s32.totalorder %s1361_s27, %s1357_s26 }
   0xb   : > { %s1452_s11 = scalar_select %p27_p1, %s1365_s28, %s29_s9  }
   0xc   : > { %p38_p5 = por %p37_p2, %p36_p0  ;;  %p1454_p6 = por %p192_p3, %p36_p0 }
   0xd   : > { %p198_p7 = scmp.eq.s32.totalorder %s1124_s30, 1  ;;  %p1733_p9 = scmp.ge.s32.totalorder %s1369_s29, 2 }
   0xf   : > { %p1458_p8 = por %p198_p7, %p197_p4  ;;  %232 = sbr.rel (%p1733_p9) target bundleno = 25 (0x19), region = 40 }
  0x14   : > { %235 = sbr.rel (!%p38_p5) target bundleno = 25 (0x19), region = 44  ;;  %s237_s14 = sand.u32 (%p38_p5), 1, %s1365_s28  }
  0x15   : > { %s1128_s15 = sshll.u32 (%p38_p5), %s1369_s29, 2  ;;  %s1127_s16 = sshll.u32 (%p38_p5), %s237_s14, 3 }
  0x16   : > { %s241_s19 = scalar_lea.vmem (%p38_p5), %s1725_s0, %s1128_s15  ;;  %s239_s20 = scalar_lea.vmem (%p38_p5), [#allocation3], %s1127_s16 }
  0x17   : > { %v258_v1 = vld [vmem:[%s241_s19] sm:$0xf] (%p38_p5)  ;;  %v260_v2 = vld [vmem:[%s241_s19 + $0x8] sm:$0xf] (%p38_p5) }
  0x18   : > { %259 = vst [vmem:[%s239_s20] sm:$0xf] (%p38_p5), %v258_v1  ;;  %261 = vst [vmem:[%s239_s20 + $0x4] sm:$0xf] (%p38_p5), %v260_v2 }
  0x19 PF: > { %p1129_p10 = scmp.ge.s32.totalorder %s1369_s29, 1  ;;  %p288_p11 = scmp.lt.s32.totalorder %s1369_s29, 3 }
  0x1b   : > { %p289_p12 = pnand %p1129_p10, %p288_p11 }
  0x1c   : > { %s1473_s21 = sand.u32 (!%p289_p12), 1, %s1361_s27   ;;  %s1372_s19 = smov (!%p289_p12), [#allocation4]  }
  0x1d   : > { %292 = sbr.rel (%p289_p12) target bundleno = 562 (0x232), region = 85  ;;  %s1130_s30 = sshll.u32 (!%p289_p12), %s1473_s21, 3 }
  0x1e   : > { %s297_s14 = scalar_lea.vmem (!%p289_p12), [#allocation3], %s1130_s30  ;;  %s1156_s30 = sshll.u32 (!%p289_p12), %s1123_s6, 4 }
  0x1f   : > { %s324_s9 = scalar_lea.vmem (!%p289_p12), [#allocation4], %s1473_s21  ;;  %s1061_s16 = scalar_lea.hbm (!%p289_p12), %s1732_s7, %s1156_s30 }
  0x20   : > { %s1063_s10 = sshll.u32 (!%p289_p12), %s324_s9, 4  ;;  %s1051_s17 = scalar_lea.sflag (!%p289_p12), [#allocation5], %s1473_s21  ;;  %s1064_s10 = int_to_ptr.vmem [resolvable:$true] %s1063_s10 }
  0x21   : > { %s1309_s18 = scalar_lea.vmem (!%p289_p12), %s1064_s10, 16  ;;  %s1313_s20 = sshll.u32 (!%p289_p12), %s1372_s19, 4  ;;  %s1314_s20 = int_to_ptr.vmem [resolvable:$false] %s1313_s20 }
  0x22   : > { %v358_v3 = vld [vmem:[%s1727_s2 + $0x70] sm:$0xff]  ;;  %v1293_v4 = vld [vmem:[%s1726_s1] sm:$0xff]   ;;  %v1371_v5 = vmov 0   ;;  %vm486_vm0 = vcmask 130048   ;;  %v359_v6 = vld [vmem:[%s1727_s2 + $0x78] sm:$0xff]  ;;  %p1310_p13 = scmp.ne.s32.totalorder %s1064_s10, %s1309_s18  ;;  %s1315_s6 = scalar_lea.vmem %s1314_s20, 32 }
  0x23   : > { %1290 = vset.pattern.permute.xlu0 %v1371_v5  ;;  %1291 = vset.pattern.permute.xlu1 %v1371_v5  ;;  %v1292_v7 = vld [vmem:[%s297_s14] sm:$0xff]   ;;  %v355_v13 = vld [vmem:[%s1727_s2 + $0x58] sm:$0xff]  ;;  %v1038_v61 = vld [vmem:[#allocation2] sm:$0x1]  ;;  %p1316_p2 = scmp.lt.s32.totalorder %s1064_s10, %s1314_s20  ;;  %p1317_p3 = scmp.lt.s32.totalorder %s1315_s6, %s1309_s18 }
  0x24   : > { %432 = vperm.xlu0 %1290, %v358_v3   ;;  %1186 = vmatprep.mubr.msk.bf16.mxu0 %vm486_vm0, %v1293_v4  ;;  %v356_v8 = vld [vmem:[%s1727_s2 + $0x60] sm:$0xff]  ;;  %v1294_v9 = vld [vmem:[%s1726_s1 + $0x8] sm:$0xff]   ;;  %v1295_v10 = vld [vmem:[%s1726_s1 + $0x10] sm:$0xff]   ;;  %p1311_p0 = pnand %p1310_p13, %p1454_p6 }
  0x25   : > { %1184 = vmatprep.subr.bf16.mxu0 %v1292_v7  ;;  %422 = vperm.xlu1 %1291, %v356_v8   ;;  %v357_v11 = vld [vmem:[%s1727_s2 + $0x68] sm:$0xff]  ;;  %v354_v12 = vld [vmem:[%s1727_s2 + $0x50] sm:$0xff]  ;;  %v352_v14 = vld [vmem:[%s1727_s2 + $0x40] sm:$0xff]  ;;  %p1318_p4 = por %p1317_p3, %p1316_p2 }
  0x26   : > { %1185 = vmatpush3.bf16.msra.mxu0 %v1292_v7  ;;  %v1296_v15 = vld [vmem:[%s1726_s1 + $0x18] sm:$0xff]   ;;  %v1297_v16 = vld [vmem:[%s1726_s1 + $0x20] sm:$0xff]   ;;  %v353_v17 = vld [vmem:[%s1727_s2 + $0x48] sm:$0xff]  ;;  %p1312_p1 = pneg %p1311_p0 }
  0x27   : > { %v350_v18 = vld [vmem:[%s1727_s2 + $0x30] sm:$0xff]  ;;  %v351_v19 = vld [vmem:[%s1727_s2 + $0x38] sm:$0xff]  ;;  %v348_v20 = vld [vmem:[%s1727_s2 + $0x20] sm:$0xff] }
  0x28   : > { %437 = vperm.xlu0 %1290, %v359_v6   ;;  %v1298_v21 = vld [vmem:[%s1726_s1 + $0x28] sm:$0xff]   ;;  %v1299_v22 = vld [vmem:[%s1726_s1 + $0x30] sm:$0xff]   ;;  %v344_v25 = vld [vmem:[%s1727_s2] sm:$0xff]  ;;  %p1319_p5 = pnand %p1318_p4, %p1312_p1 }
  0x29   : > { %1187 = vmatmul.mubr.msk.bf16.vlgmr.msra.gmra.mxu0 %vm486_vm0, %v1294_v9  ;;  %427 = vperm.xlu1 %1291, %v357_v11   ;;  %v349_v23 = vld [vmem:[%s1727_s2 + $0x28] sm:$0xff]  ;;  %v346_v24 = vld [vmem:[%s1727_s2 + $0x10] sm:$0xff]  ;;  %v347_v26 = vld [vmem:[%s1727_s2 + $0x18] sm:$0xff] }
  0x2a   : > { %1190 = vmatprep.mubr.msk.bf16.mxu0 %vm486_vm0, %v1295_v10  ;;  %v1300_v27 = vld [vmem:[%s1726_s1 + $0x38] sm:$0xff]   ;;  %v345_v28 = vld [vmem:[%s1727_s2 + $0x8] sm:$0xff]  ;;  %v648_v29 = vld [vmem:[%s1729_s4] sm:$0xff] }
  0x2b   : > { %v649_v30 = vld [vmem:[%s1729_s4 + $0x8] sm:$0xff]  ;;  %v650_v31 = vld [vmem:[%s1729_s4 + $0x10] sm:$0xff]  ;;  %v651_v32 = vld [vmem:[%s1729_s4 + $0x18] sm:$0xff] }
  0x2c   : > { %412 = vperm.xlu0 %1290, %v354_v12   ;;  %v652_v33 = vld [vmem:[%s1729_s4 + $0x20] sm:$0xff]  ;;  %v653_v34 = vld [vmem:[%s1729_s4 + $0x28] sm:$0xff]  ;;  %v907_v37 = vld [vmem:[%s1730_s5 + $0x10] sm:$0xff] }
  0x2d   : > { %417 = vperm.xlu1 %1291, %v355_v13   ;;  %v905_v35 = vld [vmem:[%s1730_s5] sm:$0xff]  ;;  %v906_v36 = vld [vmem:[%s1730_s5 + $0x8] sm:$0xff]  ;;  %v908_v38 = vld [vmem:[%s1730_s5 + $0x18] sm:$0xff] }
  0x2e   : > { %v654_v39 = vld [vmem:[%s1729_s4 + $0x30] sm:$0xff]  ;;  %v909_v40 = vld [vmem:[%s1730_s5 + $0x20] sm:$0xff]  ;;  %v655_v41 = vld [vmem:[%s1729_s4 + $0x38] sm:$0xff] }
  0x2f   : > { %v910_v42 = vld [vmem:[%s1730_s5 + $0x28] sm:$0xff]  ;;  %v656_v43 = vld [vmem:[%s1729_s4 + $0x40] sm:$0xff]  ;;  %v911_v44 = vld [vmem:[%s1730_s5 + $0x30] sm:$0xff] }
  0x30   : > { %402 = vperm.xlu0 %1290, %v352_v14   ;;  %v657_v45 = vld [vmem:[%s1729_s4 + $0x48] sm:$0xff]  ;;  %v912_v46 = vld [vmem:[%s1730_s5 + $0x38] sm:$0xff]  ;;  %v658_v47 = vld [vmem:[%s1729_s4 + $0x50] sm:$0xff] }
  0x31   : > { %1191 = vmatmul.mubr.msk.bf16.gmra.mxu0 %vm486_vm0, %v1296_v15  ;;  %407 = vperm.xlu1 %1291, %v353_v17   ;;  %v913_v48 = vld [vmem:[%s1730_s5 + $0x40] sm:$0xff]  ;;  %v659_v49 = vld [vmem:[%s1729_s4 + $0x58] sm:$0xff]  ;;  %v914_v50 = vld [vmem:[%s1730_s5 + $0x48] sm:$0xff] }
  0x32   : > { %1194 = vmatprep.mubr.msk.bf16.mxu0 %vm486_vm0, %v1297_v16  ;;  %v660_v51 = vld [vmem:[%s1729_s4 + $0x60] sm:$0xff]  ;;  %v915_v52 = vld [vmem:[%s1730_s5 + $0x50] sm:$0xff]  ;;  %v661_v53 = vld [vmem:[%s1729_s4 + $0x68] sm:$0xff] }
  0x33   : > { %v916_v54 = vld [vmem:[%s1730_s5 + $0x58] sm:$0xff]  ;;  %v662_v55 = vld [vmem:[%s1729_s4 + $0x70] sm:$0xff]  ;;  %v917_v56 = vld [vmem:[%s1730_s5 + $0x60] sm:$0xff] }
  0x34   : > { %392 = vperm.xlu0 %1290, %v350_v18   ;;  %v663_v57 = vld [vmem:[%s1729_s4 + $0x78] sm:$0xff]  ;;  %v918_v58 = vld [vmem:[%s1730_s5 + $0x68] sm:$0xff]  ;;  %v919_v59 = vld [vmem:[%s1730_s5 + $0x70] sm:$0xff] }
  0x35   : > { %397 = vperm.xlu1 %1291, %v351_v19   ;;  %v920_v60 = vld [vmem:[%s1730_s5 + $0x78] sm:$0xff]  ;;  %v1301_v62 = vld [vmem:[%s1728_s3] sm:$0xff]   ;;  %v1302_v63 = vld [vmem:[%s1728_s3 + $0x10] sm:$0xff]  }
  0x36   : > { %1222 = vmatprep.mubr.bf16.mxu1 %v1302_v63 }
  0x38   : > { %382 = vperm.xlu0 %1290, %v348_v20  }
  0x39   : > { %1195 = vmatmul.mubr.msk.bf16.gmra.mxu0 %vm486_vm0, %v1298_v21  ;;  %387 = vperm.xlu1 %1291, %v349_v23  }
  0x3a   : > { %1198 = vmatprep.mubr.msk.bf16.mxu0 %vm486_vm0, %v1299_v22 }
  0x3c   : > { %372 = vperm.xlu0 %1290, %v346_v24  }
  0x3d   : > { %377 = vperm.xlu1 %1291, %v347_v26  }
  0x40   : > { %362 = vperm.xlu0 %1290, %v344_v25  }
  0x41   : > { %1199 = vmatmul.mubr.msk.bf16.gmra.mxu0 %vm486_vm0, %v1300_v27  ;;  %367 = vperm.xlu1 %1291, %v345_v28  }
  0x42   : > { %1218 = vmatprep.mubr.bf16.mxu0 %v1301_v62 }
  0x44   : > { %666 = vperm.xlu0 %1290, %v648_v29  }
  0x45   : > { %671 = vperm.xlu1 %1291, %v649_v30  }
  0x48   : > { %676 = vperm.xlu0 %1290, %v650_v31  }
  0x49   : > { %681 = vperm.xlu1 %1291, %v651_v32  }
  0x4c   : > { %686 = vperm.xlu0 %1290, %v652_v33  }
  0x4d   : > { %691 = vperm.xlu1 %1291, %v653_v34  }
  0x50   : > { %923 = vperm.xlu0 %1290, %v905_v35  }
  0x51   : > { %928 = vperm.xlu1 %1291, %v906_v36  }
  0x54   : > { %933 = vperm.xlu0 %1290, %v907_v37  }
  0x55   : > { %938 = vperm.xlu1 %1291, %v908_v38  }
  0x58   : > { %696 = vperm.xlu0 %1290, %v654_v39  }
  0x59   : > { %943 = vperm.xlu1 %1291, %v909_v40  }
  0x5c   : > { %701 = vperm.xlu0 %1290, %v655_v41  }
  0x5d   : > { %948 = vperm.xlu1 %1291, %v910_v42  }
  0x60   : > { %706 = vperm.xlu0 %1290, %v656_v43  }
  0x61   : > { %953 = vperm.xlu1 %1291, %v911_v44  }
  0x64   : > { %711 = vperm.xlu0 %1290, %v657_v45  }
  0x65   : > { %958 = vperm.xlu1 %1291, %v912_v46  }
  0x68   : > { %716 = vperm.xlu0 %1290, %v658_v47  }
  0x69   : > { %963 = vperm.xlu1 %1291, %v913_v48  }
  0x6c   : > { %721 = vperm.xlu0 %1290, %v659_v49  }
  0x6d   : > { %968 = vperm.xlu1 %1291, %v914_v50  }
  0x70   : > { %726 = vperm.xlu0 %1290, %v660_v51  }
  0x71   : > { %973 = vperm.xlu1 %1291, %v915_v52  }
  0x74   : > { %731 = vperm.xlu0 %1290, %v661_v53  }
  0x75   : > { %978 = vperm.xlu1 %1291, %v916_v54  }
  0x78   : > { %736 = vperm.xlu0 %1290, %v662_v55  }
  0x79   : > { %983 = vperm.xlu1 %1291, %v917_v56  }
  0x7c   : > { %741 = vperm.xlu0 %1290, %v663_v57  }
  0x7d   : > { %988 = vperm.xlu1 %1291, %v918_v58  }
  0x80   : > { %993 = vperm.xlu0 %1290, %v919_v59  }
  0x81   : > { %998 = vperm.xlu1 %1291, %v920_v60  }
  0x84   : > { %1041 = vperm.xlu0 %1290, %v1038_v61  }
  0x9f   : > { %v433_v6 = vpop.permute.xlu0 %432 }
  0xa0   : > { %v423_v4 = vpop.permute.xlu1 %422 }
  0xa3   : > { %v438_v11 = vpop.permute.xlu0 %437 }
  0xa4   : > { %v428_v9 = vpop.permute.xlu1 %427 }
  0xa7   : > { %v413_v16 = vpop.permute.xlu0 %412 }
  0xa8   : > { %v418_v14 = vpop.permute.xlu1 %417 }
  0xab   : > { %v403_v22 = vpop.permute.xlu0 %402 }
  0xac   : > { %v408_v19 = vpop.permute.xlu1 %407 }
  0xaf   : > { %v393_v36 = vpop.permute.xlu0 %392 }
  0xb0   : > { %v398_v31 = vpop.permute.xlu1 %397 }
  0xb3   : > { %v383_v46 = vpop.permute.xlu0 %382 }
  0xb4   : > { %v388_v42 = vpop.permute.xlu1 %387 }
  0xb7   : > { %v373_v55 = vpop.permute.xlu0 %372 }
  0xb8   : > { %v378_v52 = vpop.permute.xlu1 %377 }
  0xbc   : > { %v368_v61 = vpop.permute.xlu1 %367 }
  0xe9   : > { %v1658_v0 = vpop.f32.mrf.mxu0 }
  0xea   : > { %v554_v59 = vadd.f32 %v1658_v0, %v373_v55 }
  0xeb   : > { %v1660_v1 = vpop.f32.mrf.mxu0 }
  0xed   : > { %v1662_v2 = vpop.f32.mrf.mxu0 }
  0xee   : > { %v557_v56 = vadd.f32 %v1662_v2, %v378_v52 }
  0xef   : > { %v1664_v3 = vpop.f32.mrf.mxu0 }
  0xf0   : > { %v611_v62 = vmax.f32 %v557_v56, 0.0  ;;  %v549_v63 = vadd.f32 %v1664_v3, %v368_v61  ;;  %v1303_v3 = vld [vmem:[%s1728_s3 + $0x8] sm:$0xff]  }
  0xf1   : > { %v1192_v5 = vpop.f32.mrf.mxu0 }
  0xf2   : > { %v570_v47 = vadd.f32 %v1192_v5, %v393_v36  ;;  %v363_v5 = vpop.permute.xlu0 %362 }
  0xf3   : > { %v561_v7 = vpop.f32.mrf.mxu0  ;;  %v546_v2 = vadd.f32 %v1660_v1, %v363_v5  ;;  %v1304_v1 = vld [vmem:[%s1728_s3 + $0x18] sm:$0xff]  }
  0xf4   : > { %v614_v53 = vmax.f32 %v570_v47, 0.0  ;;  %v562_v54 = vadd.f32 %v561_v7, %v383_v46 }
  0xf5   : > { %v1193_v8 = vpop.f32.mrf.mxu0  ;;  %v608_v0 = vmax.f32 %v546_v2, 0.0 }
  0xf6   : > { %v573_v43 = vadd.f32 %v1193_v8, %v398_v31  ;;  %v612_v60 = vmax.f32 %v562_v54, 0.0  ;;  %v609_v8 = vmax.f32 %v549_v63, 0.0 }
  0xf7   : > { %v564_v10 = vpop.f32.mrf.mxu0 }
  0xf8   : > { %v615_v49 = vmax.f32 %v573_v43, 0.0  ;;  %v565_v50 = vadd.f32 %v564_v10, %v388_v42  ;;  %v1305_v10 = vld [vmem:[%s1728_s3 + $0x20] sm:$0xff]  }
  0xf9   : > { %v1196_v12 = vpop.f32.mrf.mxu0 }
  0xfa   : > { %v586_v32 = vadd.f32 %v1196_v12, %v413_v16  ;;  %v643_v57 = vpack.c.bf16 %v615_v49, %v614_v53  ;;  %v613_v58 = vmax.f32 %v565_v50, 0.0  ;;  %v1307_v12 = vld [vmem:[%s1728_s3 + $0x30] sm:$0xff]  }
  0xfb   : > { %v577_v13 = vpop.f32.mrf.mxu0 }
  0xfc   : > { %v618_v40 = vmax.f32 %v586_v32, 0.0  ;;  %v578_v41 = vadd.f32 %v577_v13, %v403_v22  ;;  %v1308_v13 = vld [vmem:[%s1728_s3 + $0x38] sm:$0xff]  }
  0xfd   : > { %v1197_v15 = vpop.f32.mrf.mxu0 }
  0xfe   : > { %v589_v27 = vadd.f32 %v1197_v15, %v418_v14  ;;  %v616_v48 = vmax.f32 %v578_v41, 0.0  ;;  %v667_v14 = vpop.permute.xlu0 %666  ;;  %v672_v15 = vpop.permute.xlu1 %671 }
  0xff   : > { %v580_v17 = vpop.f32.mrf.mxu0 }
 0x100   : > { %v619_v37 = vmax.f32 %v589_v27, 0.0  ;;  %v581_v38 = vadd.f32 %v580_v17, %v408_v19 }
 0x101   : > { %v1200_v18 = vpop.f32.mrf.mxu0 }
 0x102   : > { %v602_v21 = vadd.f32 %v1200_v18, %v433_v6  ;;  %v645_v44 = vpack.c.bf16 %v619_v37, %v618_v40  ;;  %v617_v45 = vmax.f32 %v581_v38, 0.0  ;;  %v610_v6 = vmax.f32 %v554_v59, 0.0  ;;  %v677_v16 = vpop.permute.xlu0 %676  ;;  %v682_v17 = vpop.permute.xlu1 %681 }
 0x103   : > { %v593_v20 = vpop.f32.mrf.mxu0 }
 0x104   : > { %v594_v24 = vadd.f32 %v593_v20, %v423_v4  ;;  %v622_v28 = vmax.f32 %v602_v21, 0.0  ;;  %v644_v51 = vpack.c.bf16 %v617_v45, %v616_v48  ;;  %v642_v4 = vpack.c.bf16 %v613_v58, %v612_v60 }
 0x105   : > { %v1201_v23 = vpop.f32.mrf.mxu0  ;;  %v641_v7 = vpack.c.bf16 %v611_v62, %v610_v6 }
 0x106   : > { %v605_v25 = vadd.f32 %v1201_v23, %v438_v11  ;;  %v620_v33 = vmax.f32 %v594_v24, 0.0  ;;  %v1306_v11 = vld [vmem:[%s1728_s3 + $0x28] sm:$0xff]   ;;  %v687_v18 = vpop.permute.xlu0 %686  ;;  %v692_v19 = vpop.permute.xlu1 %691 }
 0x107   : > { %v596_v26 = vpop.f32.mrf.mxu0 }
 0x108   : > { %v623_v29 = vmax.f32 %v605_v25, 0.0  ;;  %v597_v30 = vadd.f32 %v596_v26, %v428_v9  ;;  %v640_v9 = vpack.c.bf16 %v609_v8, %v608_v0 }
 0x10a   : > { %v647_v34 = vpack.c.bf16 %v623_v29, %v622_v28  ;;  %v621_v35 = vmax.f32 %v597_v30, 0.0  ;;  %v924_v20 = vpop.permute.xlu0 %923  ;;  %v929_v21 = vpop.permute.xlu1 %928 }
 0x10c   : > { %v646_v39 = vpack.c.bf16 %v621_v35, %v620_v33  ;;  %1202 = vmatprep.subr.bf16.mxu0 %v647_v34  ;;  %1234 = vmatprep.subr.bf16.mxu1 %v647_v34 }
 0x10d   : > { %1203 = vmatpush3.bf16.msra.mxu0 %v647_v34  ;;  %1242 = vmatpush3.bf16.msra.mxu1 %v647_v34 }
 0x10e   : > { %1204 = vmatprep.subr.bf16.mxu0 %v646_v39  ;;  %1235 = vmatprep.subr.bf16.mxu1 %v646_v39  ;;  %v934_v22 = vpop.permute.xlu0 %933  ;;  %v939_v23 = vpop.permute.xlu1 %938 }
 0x111   : > { %1205 = vmatpush3.bf16.msra.mxu0 %v646_v39  ;;  %1243 = vmatpush3.bf16.msra.mxu1 %v646_v39 }
 0x112   : > { %1206 = vmatprep.subr.bf16.mxu0 %v645_v44  ;;  %1236 = vmatprep.subr.bf16.mxu1 %v645_v44  ;;  %v697_v24 = vpop.permute.xlu0 %696  ;;  %v944_v25 = vpop.permute.xlu1 %943 }
 0x115   : > { %1207 = vmatpush3.bf16.msra.mxu0 %v645_v44  ;;  %1244 = vmatpush3.bf16.msra.mxu1 %v645_v44 }
 0x116   : > { %1208 = vmatprep.subr.bf16.mxu0 %v644_v51  ;;  %1237 = vmatprep.subr.bf16.mxu1 %v644_v51  ;;  %v702_v26 = vpop.permute.xlu0 %701  ;;  %v949_v27 = vpop.permute.xlu1 %948 }
 0x119   : > { %1209 = vmatpush3.bf16.msra.mxu0 %v644_v51  ;;  %1245 = vmatpush3.bf16.msra.mxu1 %v644_v51 }
 0x11a   : > { %1210 = vmatprep.subr.bf16.mxu0 %v643_v57  ;;  %1238 = vmatprep.subr.bf16.mxu1 %v643_v57  ;;  %v707_v28 = vpop.permute.xlu0 %706  ;;  %v954_v29 = vpop.permute.xlu1 %953 }
 0x11d   : > { %1211 = vmatpush3.bf16.msra.mxu0 %v643_v57  ;;  %1246 = vmatpush3.bf16.msra.mxu1 %v643_v57 }
 0x11e   : > { %1212 = vmatprep.subr.bf16.mxu0 %v642_v4  ;;  %1239 = vmatprep.subr.bf16.mxu1 %v642_v4  ;;  %v712_v30 = vpop.permute.xlu0 %711  ;;  %v959_v31 = vpop.permute.xlu1 %958 }
 0x121   : > { %1213 = vmatpush3.bf16.msra.mxu0 %v642_v4  ;;  %1247 = vmatpush3.bf16.msra.mxu1 %v642_v4 }
 0x122   : > { %1214 = vmatprep.subr.bf16.mxu0 %v641_v7  ;;  %1240 = vmatprep.subr.bf16.mxu1 %v641_v7  ;;  %v717_v32 = vpop.permute.xlu0 %716  ;;  %v964_v35 = vpop.permute.xlu1 %963 }
 0x125   : > { %1215 = vmatpush3.bf16.msra.mxu0 %v641_v7  ;;  %1248 = vmatpush3.bf16.msra.mxu1 %v641_v7 }
 0x126   : > { %1216 = vmatprep.subr.bf16.mxu0 %v640_v9  ;;  %1241 = vmatprep.subr.bf16.mxu1 %v640_v9  ;;  %v722_v41 = vpop.permute.xlu0 %721  ;;  %v969_v48 = vpop.permute.xlu1 %968 }
 0x129   : > { %1217 = vmatpush3.bf16.msra.mxu0 %v640_v9  ;;  %1249 = vmatpush3.bf16.msra.mxu1 %v640_v9 }
 0x12a   : > { %v727_v58 = vpop.permute.xlu0 %726  ;;  %v974_v4 = vpop.permute.xlu1 %973 }
 0x12c   : > { %1219 = vmatmul.mubr.bf16.vlgmr.msra.gmra.mxu0 %v1303_v3  ;;  %1223 = vmatmul.mubr.bf16.vlgmr.msra.gmra.mxu1 %v1304_v1 }
 0x12d   : > { %1226 = vmatprep.mubr.bf16.mxu1 %v1305_v10 }
 0x134   : > { %1227 = vmatmul.mubr.bf16.gmra.mxu1 %v1306_v11  ;;  %v732_v11 = vpop.permute.xlu0 %731 }
 0x135   : > { %1230 = vmatprep.mubr.bf16.mxu1 %v1307_v12 }
 0x13c   : > { %1231 = vmatmul.mubr.bf16.gmra.mxu1 %v1308_v13 }
 0x1ec   : > { %v1220_v33 = vpop.f32.mrf.mxu0  ;;  %v1224_v34 = vpop.f32.mrf.mxu1 }
 0x1ed   : > { %v835_v42 = vadd.f32 %v1220_v33, %v677_v16  ;;  %v851_v61 = vadd.f32 %v1224_v34, %v697_v24  ;;  %v737_v34 = vpop.permute.xlu0 %736 }
 0x1ee   : > { %v826_v36 = vpop.f32.mrf.mxu0  ;;  %v842_v37 = vpop.f32.mrf.mxu1 }
 0x1ef   : > { %v827_v38 = vadd.f32 %v826_v36, %v667_v14  ;;  %v891_v50 = vmax.f32 %v835_v42, 0.0  ;;  %v843_v51 = vadd.f32 %v842_v37, %v687_v18  ;;  %v895_v9 = vmax.f32 %v851_v61, 0.0 }
 0x1f0   : > { %v1221_v39 = vpop.f32.mrf.mxu0  ;;  %v1225_v40 = vpop.f32.mrf.mxu1 }
 0x1f1   : > { %v889_v45 = vmax.f32 %v827_v38, 0.0  ;;  %v838_v46 = vadd.f32 %v1221_v39, %v682_v17  ;;  %v1003_v60 = vmul.f32 %v934_v22, %v891_v50  ;;  %v893_v62 = vmax.f32 %v843_v51, 0.0  ;;  %v979_v17 = vpop.permute.xlu1 %978 }
 0x1f2   : > { %v829_v43 = vpop.f32.mrf.mxu0  ;;  %v845_v44 = vpop.f32.mrf.mxu1  ;;  %v854_v2 = vadd.f32 %v1225_v40, %v702_v26 }
 0x1f3   : > { %v830_v47 = vadd.f32 %v829_v43, %v672_v15  ;;  %v1001_v54 = vmul.f32 %v924_v20, %v889_v45  ;;  %v892_v55 = vmax.f32 %v838_v46, 0.0  ;;  %v846_v57 = vadd.f32 %v845_v44, %v692_v19  ;;  %v742_v45 = vpop.permute.xlu0 %741 }
 0x1f4   : > { %v1228_v49 = vpop.f32.mrf.mxu1  ;;  %v1005_v3 = vmul.f32 %v944_v25, %v893_v62  ;;  %v896_v13 = vmax.f32 %v854_v2, 0.0  ;;  %v1007_v19 = vmul.f32 %v954_v29, %v895_v9 }
 0x1f5   : > { %v890_v52 = vmax.f32 %v830_v47, 0.0  ;;  %v1004_v6 = vmul.f32 %v939_v23, %v892_v55  ;;  %v894_v8 = vmax.f32 %v846_v57, 0.0  ;;  %v984_v39 = vpop.permute.xlu1 %983 }
 0x1f6   : > { %v858_v53 = vpop.f32.mrf.mxu1  ;;  %v1008_v23 = vmul.f32 %v959_v31, %v896_v13 }
 0x1f7   : > { %v1002_v56 = vmul.f32 %v929_v21, %v890_v52  ;;  %v859_v10 = vadd.f32 %v858_v53, %v707_v28  ;;  %v1006_v14 = vmul.f32 %v949_v27, %v894_v8  ;;  %v867_v21 = vadd.f32 %v1228_v49, %v717_v32  ;;  %v994_v55 = vpop.permute.xlu0 %993 }
 0x1f8   : > { %v1229_v59 = vpop.f32.mrf.mxu1 }
 0x1f9   : > { %v1017_v63 = vadd.f32 %v1002_v56, %v1001_v54  ;;  %v897_v22 = vmax.f32 %v859_v10, 0.0  ;;  %v870_v26 = vadd.f32 %v1229_v59, %v722_v41  ;;  %v899_v36 = vmax.f32 %v867_v21, 0.0  ;;  %v989_v49 = vpop.permute.xlu1 %988 }
 0x1fa   : > { %v861_v5 = vpop.f32.mrf.mxu1 }
 0x1fb   : > { %v1018_v7 = vadd.f32 %v1017_v63, %v1003_v60  ;;  %v862_v16 = vadd.f32 %v861_v5, %v712_v30  ;;  %v1009_v28 = vmul.f32 %v964_v35, %v897_v22  ;;  %v900_v40 = vmax.f32 %v870_v26, 0.0 }
 0x1fc   : > { %v1232_v0 = vpop.f32.mrf.mxu1  ;;  %v1011_v43 = vmul.f32 %v974_v4, %v899_v36  ;;  %v1044_v60 = vlaneseq }
 0x1fd   : > { %v1019_v1 = vadd.f32 %v1018_v7, %v1004_v6  ;;  %v898_v33 = vmax.f32 %v862_v16, 0.0  ;;  %v883_v44 = vadd.f32 %v1232_v0, %v737_v34  ;;  %v1012_v31 = vmul.f32 %v979_v17, %v900_v40  ;;  %v999_v57 = vpop.permute.xlu1 %998  ;;  %v1042_v7 = vpop.permute.xlu0 %1041 }
 0x1fe   : > { %v874_v12 = vpop.f32.mrf.mxu1  ;;  %v1045_v63 = vshrl.u32 %v1044_v60, 7 }
 0x1ff   : > { %v1020_v15 = vadd.f32 %v1019_v1, %v1005_v3  ;;  %v875_v38 = vadd.f32 %v874_v12, %v727_v58  ;;  %v1010_v30 = vmul.f32 %v969_v48, %v898_v33  ;;  %v903_v50 = vmax.f32 %v883_v44, 0.0 }
 0x200   : > { %v1233_v18 = vpop.f32.mrf.mxu1  ;;  %v1046_v6 = vsub.s32 0, %v1045_v63 }
 0x201   : > { %v1021_v20 = vadd.f32 %v1020_v15, %v1006_v14  ;;  %v901_v32 = vmax.f32 %v875_v38, 0.0  ;;  %v886_v41 = vadd.f32 %v1233_v18, %v742_v45  ;;  %v1015_v48 = vmul.f32 %v994_v55, %v903_v50 }
 0x202   : > { %v877_v25 = vpop.f32.mrf.mxu1  ;;  %v1047_v0 = vrot.slane %v1042_v7, %v1046_v6 }
 0x203   : > { %v1022_v24 = vadd.f32 %v1021_v20, %v1007_v19  ;;  %v878_v42 = vadd.f32 %v877_v25, %v732_v11  ;;  %v1013_v51 = vmul.f32 %v984_v39, %v901_v32  ;;  %v904_v53 = vmax.f32 %v886_v41, 0.0 }
 0x205   : > { %v1023_v37 = vadd.f32 %v1022_v24, %v1008_v23  ;;  %v902_v47 = vmax.f32 %v878_v42, 0.0  ;;  %v1016_v58 = vmul.f32 %v999_v57, %v904_v53 }
 0x207   : > { %v1024_v27 = vadd.f32 %v1023_v37, %v1009_v28  ;;  %v1014_v54 = vmul.f32 %v989_v49, %v902_v47 }
 0x209   : > { %v1025_v29 = vadd.f32 %v1024_v27, %v1010_v30 }
 0x20b   : > { %v1026_v46 = vadd.f32 %v1025_v29, %v1011_v43 }
 0x20d   : > { %v1027_v35 = vadd.f32 %v1026_v46, %v1012_v31 }
 0x20f   : > { %v1028_v52 = vadd.f32 %v1027_v35, %v1013_v51 }
 0x211   : > { %v1029_v56 = vadd.f32 %v1028_v52, %v1014_v54 }
 0x213   : > { %v1030_v59 = vadd.f32 %v1029_v56, %v1015_v48 }
 0x215   : > { %v1031_v61 = vadd.f32 %v1030_v59, %v1016_v58 }
 0x217   : > { %v1032_v62 = vrot.slane %v1031_v61, 4 }
 0x219   : > { %v1033_v4 = vadd.f32 %v1032_v62, %v1031_v61 }
 0x21b   : > { %v1034_v5 = vrot.slane %v1033_v4, 2 }
 0x21d   : > { %v1035_v2 = vadd.f32 %v1034_v5, %v1033_v4 }
 0x21f   : > { %v1036_v8 = vrot.slane %v1035_v2, 1 }
 0x221   : > { %v1037_v9 = vadd.f32 %v1036_v8, %v1035_v2 }
 0x223   : > { %v1048_v3 = vadd.f32 %v1047_v0, %v1037_v9 }
 0x225   : > { %1049 = vst [vmem:[%s324_s9] sm:$0x1] %v1048_v3 }
 0x226   : > { %1322 = shalt.err (!%p1319_p5)
}
 0x227   : > { %s1323_s22 = scalar_lea.hbm %s1061_s16, 16  ;;  %s1327_s24 = scalar_lea.hbm %s1732_s7, 32 }
 0x228   : > { %p1324_p7 = scmp.ne.s32.totalorder %s1061_s16, %s1323_s22  ;;  %p1328_p12 = scmp.lt.s32.totalorder %s1061_s16, %s1732_s7 }
 0x229   : > { %p1329_p13 = scmp.lt.s32.totalorder %s1327_s24, %s1323_s22 }
 0x22a   : > { %p1325_p10 = pnand %p1324_p7, %p1454_p6 }
 0x22b   : > { %p1330_p0 = por %p1329_p13, %p1328_p12 }
 0x22c   : > { %p1326_p11 = pneg %p1325_p10 }
 0x22e   : > { %p1331_p9 = pnand %p1330_p0, %p1326_p11 }
 0x230   : > { %1334 = shalt.err (!%p1331_p9)
}
 0x231   : > { %1250 = dma.vmem_to_hbm [thread:$0]  (%p1454_p6), %s1064_s10, 16, %s1061_s16, %s1051_s17  }
 0x232 PF: > { %s1075_s9 = sand.u32 1, %s1357_s26   ;;  %p1736_p1 = scmp.ge.s32.totalorder %s1369_s29, 2 }
 0x233   : > { %s1076_s14 = scalar_lea.sflag [#allocation5], %s1075_s9 }
 0x234   : > { %p1253_p2 = pnand %p1736_p1, %p1458_p8 }
 0x236   : > { %p1254_p3 = pneg %p1253_p2 }
 0x238   : > { %1352 = dma.done.wait (%p1254_p3), %s1076_s14, 16  }
 0x239   : > { %1354 = vsyncadd (%p1254_p3), %s1076_s14, 4294967280  ;;  %p19_p9 = scmp.ge.s32.totalorder %s1439_s8, 4   ;;  %s1737_s26 = smov %s1361_s27 }
 0x23a   : > { %s1738_s27 = smov %s1365_s28  ;;  %s1739_s28 = smov %s1452_s11 }
 0x23b   : > { %s1740_s29 = smov %s1439_s8  ;;  %21 = sbr.rel (!%p19_p9) target bundleno = 6 (0x6), region = 129 }
 0x240   :  { %1080 = vsyncpa [#allocation5], 1 }
 0x241   :  { %1082 = vsyncpa [#allocation5 + $0x1], 1 }

</bundles_post_ra>
